<compile_context>
chip_gen: v6e
topology: v6e:2x2x1
jax: 0.10.0
libtpu: 0.0.40
codegen_flags: <defaults>
</compile_context>

<pallas_src>
import functools

import jax
import jax.numpy as jnp
from jax.experimental import pallas as pl
from jax.experimental.pallas import tpu as pltpu


def _vae_mlp_kernel(dims, x_ref, w1_ref, w2_ref, w3_ref, w4_ref, b_ref, out_ref):
    """One grid step = one tile of B*N rows.  Everything lives in VMEM."""
    H1, L, H2, D = dims
    x = x_ref[...]                       # (TM, D)

    # Packed biases: row i holds bias_i zero-padded to PW lanes (prefix slices).
    b1 = b_ref[0:1, :H1]
    b2 = b_ref[1:2, :L]
    b3 = b_ref[2:3, :H2]
    b4 = b_ref[3:4, :D]

    # ---------------- Encoder MLP ----------------
    h1 = jnp.maximum(
        jnp.dot(x, w1_ref[...], preferred_element_type=jnp.float32) + b1, 0.0)
    y = jnp.dot(h1, w2_ref[...], preferred_element_type=jnp.float32) + b2

    # Adjacency encode/decode cancels exactly on the returned output:
    #   inv(A2) @ (A2 @ (y + bias) - bias + bias) - bias == y
    # so t == y and no (N,N) matmuls / inverse are needed here.

    # ---------------- Decoder MLP ----------------
    h2 = jnp.maximum(
        jnp.dot(y, w3_ref[...], preferred_element_type=jnp.float32) + b3, 0.0)
    out_ref[...] = (jnp.dot(h2, w4_ref[...], preferred_element_type=jnp.float32)
                    + b4)


@jax.jit
def vae_forward(x, params):
    """Full VAE forward pass.  x: (B, N, D) -> (B, N, D) float32."""
    B, N, D = x.shape
    H1 = params["w1"].shape[1]
    L = params["w2"].shape[1]
    H2 = params["w3"].shape[1]

    # The Linear layers act only on the last dim, and the adjacency path is an
    # identity on the output, so fold batch and num_vars into one M dimension.
    M = B * N
    x2 = x.astype(jnp.float32).reshape(M, D)

    # Row tile: whole batch in one block when small; otherwise a divisor tile.
    TM = M
    for cand in (1024, 512, 256, 128):
        if M > cand and M % cand == 0:
            TM = cand
            break
    grid_m = M // TM

    w1 = params["w1"].astype(jnp.float32)
    w2 = params["w2"].astype(jnp.float32)
    w3 = params["w3"].astype(jnp.float32)
    w4 = params["w4"].astype(jnp.float32)

    # Pack the 4 bias vectors into one zero-padded (4, PW) block: a single
    # replicated input / DMA instead of four tiny (1, H) ones.
    PW = max(H1, L, H2, D)
    biases = jnp.zeros((4, PW), jnp.float32)
    biases = biases.at[0, :H1].set(params["b1"].astype(jnp.float32))
    biases = biases.at[1, :L].set(params["b2"].astype(jnp.float32))
    biases = biases.at[2, :H2].set(params["b3"].astype(jnp.float32))
    biases = biases.at[3, :D].set(params["b4"].astype(jnp.float32))

    rep = lambda i: (0, 0)   # replicated (same block every grid step)

    out2 = pl.pallas_call(
        functools.partial(_vae_mlp_kernel, (H1, L, H2, D)),
        out_shape=jax.ShapeDtypeStruct((M, D), jnp.float32),
        grid_spec=pltpu.PrefetchScalarGridSpec(
            num_scalar_prefetch=0,
            grid=(grid_m,),
            in_specs=[
                pl.BlockSpec((TM, D), lambda i: (i, 0)),   # x rows
                pl.BlockSpec((D, H1), rep),                # w1
                pl.BlockSpec((H1, L), rep),                # w2
                pl.BlockSpec((L, H2), rep),                # w3
                pl.BlockSpec((H2, D), rep),                # w4
                pl.BlockSpec((4, PW), rep),                # packed biases
            ],
            out_specs=pl.BlockSpec((TM, D), lambda i: (i, 0)),
        ),
        compiler_params=pltpu.CompilerParams(
            dimension_semantics=("parallel",)),
    )(x2, w1, w2, w3, w4, biases)

    return out2.reshape(B, N, D)


def _reference(x, params):
    """Pure-JAX reference matching the full PyTorch forward semantics (f32),
    including the adjacency matmul and its inverse (which cancel)."""
    N = params["adj_A"].shape[0]
    adj_A = params["adj_A"]
    amped = jnp.sinh(3.0 * adj_A)
    a2 = jnp.eye(N, dtype=jnp.float32) - amped.T
    ainv = jnp.linalg.inv(a2)
    bias = params["bias"]

    h1 = jax.nn.relu(x @ params["w1"] + params["b1"])
    y = h1 @ params["w2"] + params["b2"]
    z = jnp.einsum("ij,bjl->bil", a2, y + bias) - bias

    t = jnp.einsum("ij,bjl->bil", ainv, z + bias) - bias
    h2 = jax.nn.relu(t @ params["w3"] + params["b3"])
    return h2 @ params["w4"] + params["b4"]


def init_params(key, num_vars, var_dim, enc_hidden, dec_hidden, latent_dim):
    ks = jax.random.split(key, 10)
    s = lambda fan_in: 1.0 / jnp.sqrt(float(fan_in))
    return {
        # adj_A is zeros in the PyTorch init; use small random values so the
        # sinh / inverse paths are actually exercised in the reference.
        "adj_A": 0.05 * jax.random.normal(ks[0], (num_vars, num_vars), jnp.float32),
        "bias": 0.1 * jax.random.normal(ks[1], (latent_dim,), jnp.float32),
        "w1": s(var_dim) * jax.random.normal(ks[2], (var_dim, enc_hidden), jnp.float32),
        "b1": s(var_dim) * jax.random.normal(ks[3], (enc_hidden,), jnp.float32),
        "w2": s(enc_hidden) * jax.random.normal(ks[4], (enc_hidden, latent_dim), jnp.float32),
        "b2": s(enc_hidden) * jax.random.normal(ks[5], (latent_dim,), jnp.float32),
        "w3": s(latent_dim) * jax.random.normal(ks[6], (latent_dim, dec_hidden), jnp.float32),
        "b3": s(latent_dim) * jax.random.normal(ks[7], (dec_hidden,), jnp.float32),
        "w4": s(dec_hidden) * jax.random.normal(ks[8], (dec_hidden, var_dim), jnp.float32),
        "b4": s(dec_hidden) * jax.random.normal(ks[9], (var_dim,), jnp.float32),
    }


if __name__ == "__main__":
    B, N, D = 2, 8, 16           # batch, num_vars, var_dim
    ENC_H, DEC_H, L = 32, 32, 4  # enc_hidden_dim, dec_hidden_dim, latent_dim

    key = jax.random.PRNGKey(0)
    kx, kp = jax.random.split(key)
    x = jax.random.normal(kx, (B, N, D), jnp.float32)
    params = init_params(kp, N, D, ENC_H, DEC_H, L)

    out = vae_forward(x, params)
    out = jax.block_until_ready(out)

    ref = _reference(x, params)
    assert out.shape == (B, N, D), out.shape
    assert jnp.allclose(out, ref, atol=1e-4, rtol=1e-4), \
        float(jnp.max(jnp.abs(out - ref)))

    print("KERNEL_OK")
</pallas_src>

<mosaic_0001>
module attributes {stable_mosaic.version = 11 : i64} {
  func.func @_vae_mlp_kernel(%arg0: i32, %arg1: memref<16x16xf32, #tpu.memory_space<vmem>>, %arg2: memref<16x32xf32, #tpu.memory_space<vmem>>, %arg3: memref<32x4xf32, #tpu.memory_space<vmem>>, %arg4: memref<4x32xf32, #tpu.memory_space<vmem>>, %arg5: memref<32x16xf32, #tpu.memory_space<vmem>>, %arg6: memref<4x32xf32, #tpu.memory_space<vmem>>, %arg7: memref<16x16xf32, #tpu.memory_space<vmem>>) attributes {dimension_semantics = [#tpu.dimension_semantics<parallel>], iteration_bounds = array<i64: 1>, scalar_prefetch = 0 : i64, scratch_operands = 0 : i64, tpu.core_type = #tpu.core_type<tc>, window_params = [{transform_indices = @transform_0, window_bounds = array<i64: 16, 16>}, {pipeline_mode = #tpu.pipeline_mode<synchronous>, transform_indices = @transform_1, window_bounds = array<i64: 16, 32>}, {pipeline_mode = #tpu.pipeline_mode<synchronous>, transform_indices = @transform_2, window_bounds = array<i64: 32, 4>}, {pipeline_mode = #tpu.pipeline_mode<synchronous>, transform_indices = @transform_3, window_bounds = array<i64: 4, 32>}, {pipeline_mode = #tpu.pipeline_mode<synchronous>, transform_indices = @transform_4, window_bounds = array<i64: 32, 16>}, {pipeline_mode = #tpu.pipeline_mode<synchronous>, transform_indices = @transform_5, window_bounds = array<i64: 4, 32>}, {transform_indices = @transform_6, window_bounds = array<i64: 16, 16>}]} {
    %c0 = arith.constant 0 : index
    %c0_0 = arith.constant 0 : index
    %0 = vector.load %arg1[%c0, %c0_0] : memref<16x16xf32, #tpu.memory_space<vmem>>, vector<16x16xf32>
    %c0_1 = arith.constant 0 : index
    %c0_2 = arith.constant 0 : index
    %1 = vector.load %arg6[%c0_1, %c0_2] : memref<4x32xf32, #tpu.memory_space<vmem>>, vector<1x32xf32>
    %c1 = arith.constant 1 : index
    %c0_3 = arith.constant 0 : index
    %2 = vector.load %arg6[%c1, %c0_3] : memref<4x32xf32, #tpu.memory_space<vmem>>, vector<1x4xf32>
    %c2 = arith.constant 2 : index
    %c0_4 = arith.constant 0 : index
    %3 = vector.load %arg6[%c2, %c0_4] : memref<4x32xf32, #tpu.memory_space<vmem>>, vector<1x32xf32>
    %c3 = arith.constant 3 : index
    %c0_5 = arith.constant 0 : index
    %4 = vector.load %arg6[%c3, %c0_5] : memref<4x32xf32, #tpu.memory_space<vmem>>, vector<1x16xf32>
    %c0_6 = arith.constant 0 : index
    %c0_7 = arith.constant 0 : index
    %5 = vector.load %arg2[%c0_6, %c0_7] : memref<16x32xf32, #tpu.memory_space<vmem>>, vector<16x32xf32>
    %cst = arith.constant dense<0.000000e+00> : vector<16x32xf32>
    %6 = tpu.matmul %0, %5, %cst {dimension_numbers = #tpu.dot_dimension_numbers<[1], [0], [0], [1], [0, 0, 1, 1], [], []>} : vector<16x16xf32>, vector<16x32xf32>, vector<16x32xf32> -> vector<16x32xf32>
    %7 = vector.broadcast %1 : vector<1x32xf32> to vector<16x32xf32>
    %8 = arith.addf %6, %7 : vector<16x32xf32>
    %cst_8 = arith.constant 0.000000e+00 : f32
    %9 = vector.broadcast %cst_8 : f32 to vector<16x32xf32>
    %10 = arith.maximumf %8, %9 : vector<16x32xf32>
    %c0_9 = arith.constant 0 : index
    %c0_10 = arith.constant 0 : index
    %11 = vector.load %arg3[%c0_9, %c0_10] : memref<32x4xf32, #tpu.memory_space<vmem>>, vector<32x4xf32>
    %cst_11 = arith.constant dense<0.000000e+00> : vector<16x4xf32>
    %12 = tpu.matmul %10, %11, %cst_11 {dimension_numbers = #tpu.dot_dimension_numbers<[1], [0], [0], [1], [0, 0, 1, 1], [], []>} : vector<16x32xf32>, vector<32x4xf32>, vector<16x4xf32> -> vector<16x4xf32>
    %13 = vector.broadcast %2 : vector<1x4xf32> to vector<16x4xf32>
    %14 = arith.addf %12, %13 : vector<16x4xf32>
    %c0_12 = arith.constant 0 : index
    %c0_13 = arith.constant 0 : index
    %15 = vector.load %arg4[%c0_12, %c0_13] : memref<4x32xf32, #tpu.memory_space<vmem>>, vector<4x32xf32>
    %cst_14 = arith.constant dense<0.000000e+00> : vector<16x32xf32>
    %16 = tpu.matmul %14, %15, %cst_14 {dimension_numbers = #tpu.dot_dimension_numbers<[1], [0], [0], [1], [0, 0, 1, 1], [], []>} : vector<16x4xf32>, vector<4x32xf32>, vector<16x32xf32> -> vector<16x32xf32>
    %17 = vector.broadcast %3 : vector<1x32xf32> to vector<16x32xf32>
    %18 = arith.addf %16, %17 : vector<16x32xf32>
    %cst_15 = arith.constant 0.000000e+00 : f32
    %19 = vector.broadcast %cst_15 : f32 to vector<16x32xf32>
    %20 = arith.maximumf %18, %19 : vector<16x32xf32>
    %c0_16 = arith.constant 0 : index
    %c0_17 = arith.constant 0 : index
    %21 = vector.load %arg5[%c0_16, %c0_17] : memref<32x16xf32, #tpu.memory_space<vmem>>, vector<32x16xf32>
    %cst_18 = arith.constant dense<0.000000e+00> : vector<16x16xf32>
    %22 = tpu.matmul %20, %21, %cst_18 {dimension_numbers = #tpu.dot_dimension_numbers<[1], [0], [0], [1], [0, 0, 1, 1], [], []>} : vector<16x32xf32>, vector<32x16xf32>, vector<16x16xf32> -> vector<16x16xf32>
    %23 = vector.broadcast %4 : vector<1x16xf32> to vector<16x16xf32>
    %24 = arith.addf %22, %23 : vector<16x16xf32>
    %c0_19 = arith.constant 0 : index
    %c0_20 = arith.constant 0 : index
    %25 = vector.load %arg7[%c0_19, %c0_20] : memref<16x16xf32, #tpu.memory_space<vmem>>, vector<16x16xf32>
    tpu.vector_store %arg7[%c0_19, %c0_20], %24 {strides = array<i32>} : memref<16x16xf32, #tpu.memory_space<vmem>>, vector<16x16xf32>,
    return
  }
  func.func @transform_0(%arg0: i32) -> (i32, i32) {
    %c0_i32 = arith.constant 0 : i32
    %c0_i32_0 = arith.constant 0 : i32
    return %arg0, %c0_i32 : i32, i32
  }
  func.func @transform_1(%arg0: i32) -> (i32, i32) {
    %c0_i32 = arith.constant 0 : i32
    %c0_i32_0 = arith.constant 0 : i32
    %c0_i32_1 = arith.constant 0 : i32
    return %c0_i32, %c0_i32_0 : i32, i32
  }
  func.func @transform_2(%arg0: i32) -> (i32, i32) {
    %c0_i32 = arith.constant 0 : i32
    %c0_i32_0 = arith.constant 0 : i32
    %c0_i32_1 = arith.constant 0 : i32
    return %c0_i32, %c0_i32_0 : i32, i32
  }
  func.func @transform_3(%arg0: i32) -> (i32, i32) {
    %c0_i32 = arith.constant 0 : i32
    %c0_i32_0 = arith.constant 0 : i32
    %c0_i32_1 = arith.constant 0 : i32
    return %c0_i32, %c0_i32_0 : i32, i32
  }
  func.func @transform_4(%arg0: i32) -> (i32, i32) {
    %c0_i32 = arith.constant 0 : i32
    %c0_i32_0 = arith.constant 0 : i32
    %c0_i32_1 = arith.constant 0 : i32
    return %c0_i32, %c0_i32_0 : i32, i32
  }
  func.func @transform_5(%arg0: i32) -> (i32, i32) {
    %c0_i32 = arith.constant 0 : i32
    %c0_i32_0 = arith.constant 0 : i32
    %c0_i32_1 = arith.constant 0 : i32
    return %c0_i32, %c0_i32_0 : i32, i32
  }
  func.func @transform_6(%arg0: i32) -> (i32, i32) {
    %c0_i32 = arith.constant 0 : i32
    %c0_i32_0 = arith.constant 0 : i32
    return %arg0, %c0_i32 : i32, i32
  }
}

</mosaic_0001>

<bundles_post_ra>
// kernel: vae_forward.1
= control target key start
LH: loop header
LB: loop body
LE: loop exit
PB: predicated region body
PF: predicated region fallthrough
CT: control target
= control target key end

     0   :  { %vm36_vm0 = vcmask 130048   ;;  %s601_s0 = inlined_call_operand.vmem [shape: f32[16,16], index: 0, kind: input, shape index: {}]   ;;  %s602_s1 = inlined_call_operand.vmem [shape: f32[16,32], index: 1, kind: input, shape index: {}]   ;;  %s603_s2 = inlined_call_operand.vmem [shape: f32[32,4], index: 2, kind: input, shape index: {}]   ;;  %s604_s3 = inlined_call_operand.vmem [shape: f32[4,32], index: 3, kind: input, shape index: {}]   ;;  %s605_s4 = inlined_call_operand.vmem [shape: f32[32,16], index: 4, kind: input, shape index: {}]   ;;  %s606_s5 = inlined_call_operand.vmem [shape: f32[4,32], index: 5, kind: input, shape index: {}]   ;;  %s607_s6 = inlined_call_operand.hbm [shape: f32[16,16], index: 6, kind: output, shape index: {}]  }
   0x1   :  { %v31_v0 = vld [vmem:[%s602_s1 + $0x8] sm:$0xff]  ;;  %v30_v1 = vld [vmem:[%s602_s1] sm:$0xff] }
   0x2   :  { %v24_v2 = vld [vmem:[%s601_s0] sm:$0xff]  ;;  %442 = vmatprep.subr.mxu1 %v31_v0 }
   0x3   :  { %446 = vmatprep.mubr.msk.f32.mxu1 %vm36_vm0, %v24_v2 }
   0x4   :  { %11 = vsyncpa [#allocation3], 0  ;;  %443 = vmatpush3.msra.mxu1 %v31_v0  ;;  %v25_v3 = vld [vmem:[%s601_s0 + $0x8] sm:$0xff]  ;;  %v123_v4 = vld [vmem:[%s603_s2 + $0x18] sm:$0xff]  ;;  %vm128_vm1 = vcmask 261120   ;;  %vm222_vm2 = vcmask 1043456  }
   0x5   :  { %444 = vmatprep.subr.mxu1 %v30_v1  ;;  %v122_v5 = vld [vmem:[%s603_s2 + $0x10] sm:$0xff]  ;;  %v121_v6 = vld [vmem:[%s603_s2 + $0x8] sm:$0xff]  ;;  %v120_v7 = vld [vmem:[%s603_s2] sm:$0xff]  ;;  %vm215_vm3 = vcmask 31744  }
   0x6   :  { %445 = vmatpush3.msra.mxu1 %v30_v1  ;;  %v410_v8 = vld [vmem:[%s606_s5] ss:$0 sm:$0xff]  ;;  %v413_v17 = vld [vmem:[%s606_s5 + $0x1] ss:$0 sm:$0xff]  ;;  %v306_v21 = vld [vmem:[%s605_s4 + $0x18] sm:$0xff] }
   0x7   :  { %447 = vmatmul.mubr.msk.f32.vlgmr.msra.gmra.mxu1 %vm36_vm0, %v25_v3  ;;  %449 = vmatprep.subr.mxu1 %v123_v4  ;;  %v210_v15 = vld [vmem:[%s604_s3] sm:$0xf]  ;;  %v305_v22 = vld [vmem:[%s605_s4 + $0x10] sm:$0xff]  ;;  %v304_v23 = vld [vmem:[%s605_s4 + $0x8] sm:$0xff] }
   0x8   :  { %450 = vmatpush3.msra.mxu1 %v123_v4  ;;  %460 = vmatprep.subr.msk.mxu0 %vm222_vm2, %v210_v15  ;;  %v303_v24 = vld [vmem:[%s605_s4] sm:$0xff]  ;;  %s501_s4 = smov [#allocation2]  }
   0x9   :  { %451 = vmatprep.subr.mxu1 %v122_v5  ;;  %461 = vmatpush3.msk.msra.mxu0 %vm222_vm2, %v210_v15  ;;  %v416_v25 = vld [vmem:[%s606_s5 + $0x2] ss:$0 sm:$0xff]  ;;  %v420_v32 = vld [vmem:[%s606_s5 + $0x3] ss:$0 sm:$0xff]  ;;  %s399_s27 = sshll.u32 %s501_s4, 4  ;;  %s400_s27 = int_to_ptr.vmem [resolvable:$true] %s399_s27 }
   0xa   :  { %452 = vmatpush3.msra.mxu1 %v122_v5  ;;  %465 = vmatprep.subr.mxu0 %v306_v21  ;;  %s479_s28 = scalar_lea.vmem %s400_s27, 256  ;;  %p484_p1 = scmp.lt.s32.totalorder %s400_s27, %s400_s27 }
   0xb   :  { %453 = vmatprep.subr.mxu1 %v121_v6  ;;  %p480_p0 = scmp.ne.s32.totalorder %s400_s27, %s479_s28  ;;  %p485_p2 = scmp.lt.s32.totalorder %s479_s28, %s479_s28 }
   0xc   :  { %454 = vmatpush3.msra.mxu1 %v121_v6 }
   0xd   :  { %455 = vmatprep.subr.mxu1 %v120_v7  ;;  %p486_p3 = por %p485_p2, %p484_p1 }
   0xe   :  { %456 = vmatpush3.msra.mxu1 %v120_v7 }
   0xf   :  { %p487_p4 = pnand %p486_p3, %p480_p0 }
  0xc7   :  { %v448_v9 = vpop.f32.mrf.mxu1 }
  0xc8   :  { %v115_v10 = vadd.f32 %v448_v9, %v410_v8 }
  0xc9   :  { %v109_v11 = vpop.f32.mrf.mxu1 }
  0xca   :  { %v110_v12 = vadd.f32 %v410_v8, %v109_v11  ;;  %v119_v14 = vmax.f32 %v115_v10, 0.0 }
  0xcc   :  { %v118_v13 = vmax.f32 %v110_v12, 0.0 }
  0xce   :  { %457 = vmatprep.mubr.msk.f32.mxu1 %vm128_vm1, %v118_v13 }
  0xcf   :  { %458 = vmatmul.mubr.msk.f32.vlgmr.msra.gmra.mxu1 %vm128_vm1, %v119_v14 }
 0x18f   :  { %v459_v16 = vpop.f32.mrf.mxu1 }
 0x190   :  { %v207_v20 = vadd.f32 %v459_v16, %v413_v17 }
 0x191   :  { %v201_v18 = vpop.f32.mrf.mxu1 }
 0x192   :  { %v202_v19 = vadd.f32 %v413_v17, %v201_v18 }
 0x194   :  { %462 = vmatprep.mubr.msk.f32.mxu0 %vm215_vm3, %v202_v19 }
 0x195   :  { %463 = vmatmul.mubr.msk.f32.vlgmr.msra.gmra.mxu0 %vm215_vm3, %v207_v20 }
 0x196   :  { %466 = vmatpush3.msra.mxu0 %v306_v21 }
 0x197   :  { %467 = vmatprep.subr.mxu0 %v305_v22 }
 0x198   :  { %468 = vmatpush3.msra.mxu0 %v305_v22 }
 0x199   :  { %469 = vmatprep.subr.mxu0 %v304_v23 }
 0x19a   :  { %470 = vmatpush3.msra.mxu0 %v304_v23 }
 0x19b   :  { %471 = vmatprep.subr.mxu0 %v303_v24 }
 0x19c   :  { %472 = vmatpush3.msra.mxu0 %v303_v24 }
 0x255   :  { %v464_v26 = vpop.f32.mrf.mxu0 }
 0x256   :  { %v298_v27 = vadd.f32 %v464_v26, %v416_v25 }
 0x257   :  { %v292_v28 = vpop.f32.mrf.mxu0 }
 0x258   :  { %v293_v29 = vadd.f32 %v416_v25, %v292_v28  ;;  %v302_v31 = vmax.f32 %v298_v27, 0.0 }
 0x25a   :  { %v301_v30 = vmax.f32 %v293_v29, 0.0 }
 0x25c   :  { %473 = vmatprep.mubr.msk.f32.mxu0 %vm128_vm1, %v301_v30 }
 0x25d   :  { %474 = vmatmul.mubr.msk.f32.vlgmr.msra.gmra.mxu0 %vm128_vm1, %v302_v31 }
 0x31d   :  { %v475_v33 = vpop.f32.mrf.mxu0 }
 0x31e   :  { %v389_v34 = vadd.f32 %v475_v33, %v420_v32 }
 0x31f   :  { %v383_v35 = vpop.f32.mrf.mxu0 }
 0x320   :  { %393 = vst.msk [vmem:[#allocation2 + $0x8] sm:$0xff] %vm36_vm0, %v389_v34  ;;  %v384_v36 = vadd.f32 %v420_v32, %v383_v35 }
 0x322   :  { %392 = vst.msk [vmem:[#allocation2] sm:$0xff] %vm36_vm0, %v384_v36 }
 0x323   :  { %490 = shalt.err (!%p487_p4)
}
 0x324   :  { %s502_s29 = smov 128   ;;  %s503_s5 = smov 8  }
 0x325   :  { %405 = dma.vmem_to_hbm [thread:$0]  %s400_s27, 256, %s607_s6, [#allocation3], %s502_s29, %s502_s29, %s503_s5  }
 0x326   :  { %499 = dma.done.wait [#allocation3], 256  }
 0x327   :  { %500 = vsyncadd [#allocation3], 4294967040 }
 0x328   :  { %409 = vsyncpa [#allocation3], 1 }

</bundles_post_ra>
